<compile_context>
chip_gen: v6e
topology: v6e:2x2x1
jax: 0.10.0
libtpu: 0.0.40
codegen_flags: <defaults>
</compile_context>

<pallas_src>
import functools

import jax
import jax.numpy as jnp
from jax.experimental import pallas as pl
from jax.experimental.pallas import tpu as pltpu


def _round_up(x, m):
    return ((x + m - 1) // m) * m


def _block_spec(block_shape, index_map, *, buffers=None):
    """BlockSpec with optional N-deep buffering; falls back if unsupported."""
    if buffers is not None and hasattr(pl, "Buffered"):
        try:
            return pl.BlockSpec(block_shape, index_map,
                                pipeline_mode=pl.Buffered(buffers))
        except TypeError:
            pass
    return pl.BlockSpec(block_shape, index_map)


# ---------------------------------------------------------------------------
# Stage 1: LayerNorm (elementwise_affine=False, eps=1e-5) + X @ W
#          grid = (row tiles, W-column tiles); W columns tiled so the weight
#          never has to be fully VMEM-resident for large D.
# ---------------------------------------------------------------------------
def _ln_xw_kernel(x_ref, w_ref, inp_ref, xw_ref, *, d_valid):
    x = x_ref[...].astype(jnp.float32)                      # [TM1, D_pad] full rows
    d_pad = x.shape[-1]

    # LayerNorm over the *valid* D features; padded lanes of x are zero, so the
    # sums only need the correct divisor plus masking of the centered values.
    mean = jnp.sum(x, axis=-1, keepdims=True) * (1.0 / d_valid)
    centered = x - mean
    if d_valid != d_pad:
        col = jax.lax.broadcasted_iota(jnp.int32, x.shape, dimension=1)
        centered = jnp.where(col < d_valid, centered, 0.0)  # zero padded lanes
    var = jnp.sum(centered * centered, axis=-1, keepdims=True) * (1.0 / d_valid)
    inputs = centered * jax.lax.rsqrt(var + 1e-5)           # pads stay 0

    # Residual copy: the (i, 0) output block is resident across the column axis,
    # so write it only once per row tile.
    @pl.when(pl.program_id(1) == 0)
    def _():
        inp_ref[...] = inputs.astype(inp_ref.dtype)

    # Matmul in the operand dtype (bf16 by default -> full MXU rate), f32 accum.
    xw_ref[...] = jnp.dot(inputs.astype(w_ref.dtype), w_ref[...],
                          preferred_element_type=jnp.float32).astype(xw_ref.dtype)


# ---------------------------------------------------------------------------
# Stage 2: out = A @ XW + b - inputs
#          Block-sparse reduction over K tiles: scalar-prefetched per-row-tile
#          nonzero-block counts/indices drive the adjacency index_map; the f32
#          output block (resident across k) is the accumulator.
# ---------------------------------------------------------------------------
def _aggregate_kernel(cnt_ref, kidx_ref, adj_ref, xw_ref, inp_ref, b_ref, o_ref, *,
                      tk, xw_resident):
    i = pl.program_id(0)
    k = pl.program_id(1)

    @pl.when(k == 0)
    def _():
        o_ref[...] = jnp.zeros_like(o_ref)

    # Skip padded steps / all-zero (TM, TK) adjacency tiles entirely.
    @pl.when(k < cnt_ref[i])
    def _():
        if xw_resident:
            kt = kidx_ref[i, k]
            xw = xw_ref[pl.ds(pl.multiple_of(kt * tk, tk), tk), :]
        else:
            xw = xw_ref[...]
        o_ref[...] += jnp.dot(adj_ref[...], xw, preferred_element_type=jnp.float32)

    @pl.when(k == pl.num_programs(1) - 1)
    def _():
        # TODO(synk): Dropout(p=0.9) is identity in eval mode; training-mode RNG
        # masking (pltpu.prng_*) not implemented here.
        o_ref[...] = o_ref[...] + b_ref[...] - inp_ref[...]


def node_encoder_forward(node_inputs, edge_index, edge_weights, gcn_weight,
                         gcn_bias, *, matmul_dtype=jnp.bfloat16,
                         tile_m=256, tile_k=1024, xw_resident=None):
    """
    node_inputs : [N, D] float32
    edge_index  : [E, 2] int32  (src, dst) — already normalized per docstring
    edge_weights: [E]    float32
    gcn_weight  : [D, D] float32
    gcn_bias    : [D]    float32
    matmul_dtype: operand dtype for the matmuls (bf16 recommended on all
                  generations; use jnp.float32 only when exact math is required)
    xw_resident : None = auto (resident when XW fits a small VMEM budget),
                  True/False to force.
    returns     : [N, D] in node_inputs.dtype
    """
    N, D = node_inputs.shape
    assert gcn_weight.shape == (D, D), "NodeEncoder assumes input_dim == output_dim"

    f32 = jnp.float32
    op_bytes = jnp.dtype(matmul_dtype).itemsize

    # ---- tile selection (lane-dense, (8,128) aligned, TM | TK | N_pad) ------
    n_ceil = _round_up(N, 128)
    D_pad = _round_up(D, 128)
    TK = min(_round_up(tile_k, 128), n_ceil)     # adjacency K tile
    TM = min(_round_up(tile_m, 128), TK)         # adjacency / output row tile
    if TK % TM != 0:
        TM = 128
    N_pad = _round_up(N, TK)
    nI, nK = N_pad // TM, N_pad // TK

    TM1 = min(512, TK)                           # stage-1 row tile (divides N_pad)
    if TK % TM1 != 0:
        TM1 = TK
    TN1 = min(1024, D_pad)                       # stage-1 W column tile
    if D_pad % TN1 != 0:
        TN1 = D_pad

    # ---- per-generation VMEM budget -----------------------------------------
    try:
        vmem_cap = int(pltpu.get_tpu_info().vmem_capacity_bytes)
    except Exception:
        vmem_cap = 64 * 1024 * 1024              # conservative (v7x-sized) fallback
    vmem_limit = min(vmem_cap * 3 // 4, 96 * 1024 * 1024)   # ~96 MiB v5e/v6e, ~48 MiB v7x

    # ---- padded operands -----------------------------------------------------
    x_pad = jnp.zeros((N_pad, D_pad), f32).at[:N, :D].set(node_inputs.astype(f32))
    w_pad = jnp.zeros((D_pad, D_pad), f32).at[:D, :D].set(gcn_weight.astype(f32))
    w_pad = w_pad.astype(matmul_dtype)           # bf16 weight operand for the MXU
    b_pad = jnp.zeros((1, D_pad), f32).at[0, :D].set(gcn_bias.astype(f32))

    # Dense adjacency A[dst, src] = w; duplicate edges scatter-added in f32 then
    # cast once to the matmul operand dtype.
    src = edge_index[:, 0].astype(jnp.int32)
    dst = edge_index[:, 1].astype(jnp.int32)
    adj = jnp.zeros((N_pad, N_pad), f32).at[dst, src].add(edge_weights.astype(f32))
    adj = adj.astype(matmul_dtype)

    # ---- block-sparsity metadata (scalar-prefetched into SMEM) ---------------
    # block_nz[i, k] = 1 iff the (TM, TK) adjacency tile (i, k) has any edge.
    blk_row = dst // TM
    blk_col = src // TK
    block_nz = (jnp.zeros((nI, nK), jnp.int32).at[blk_row, blk_col].add(1) > 0)
    block_nz = block_nz.astype(jnp.int32)
    counts = jnp.sum(block_nz, axis=1).astype(jnp.int32)                 # [nI]

    col_ids = jnp.broadcast_to(jnp.arange(nK, dtype=jnp.int32)[None, :], (nI, nK))
    keys = jnp.where(block_nz > 0, col_ids, nK)          # nonzero cols first, ascending
    order = jnp.argsort(keys, axis=1).astype(jnp.int32)                  # [nI, nK]

    try:
        max_k_steps = max(1, int(counts.max()))          # grid extent (host value)
    except Exception:
        # Under jit/tracing: fall back to dense K iteration (compute still gated).
        max_k_steps = max(1, nK)

    # Pad each row's index list by repeating its last valid index so the pipeline
    # sees an unchanged block index (no re-DMA) on padded steps.
    pos = jnp.arange(max_k_steps, dtype=jnp.int32)[None, :]
    take = jnp.minimum(pos, jnp.maximum(counts - 1, 0)[:, None])
    kidx = jnp.take_along_axis(order, take, axis=1).astype(jnp.int32)    # [nI, S]

    # ---- stage 1: LayerNorm + X @ W ------------------------------------------
    inputs_norm, xw = pl.pallas_call(
        functools.partial(_ln_xw_kernel, d_valid=D),
        out_shape=(jax.ShapeDtypeStruct((N_pad, D_pad), f32),
                   jax.ShapeDtypeStruct((N_pad, D_pad), matmul_dtype)),
        grid_spec=pltpu.PrefetchScalarGridSpec(
            num_scalar_prefetch=0,
            grid=(N_pad // TM1, D_pad // TN1),
            in_specs=[pl.BlockSpec((TM1, D_pad), lambda i, j: (i, 0)),   # x rows (resident)
                      pl.BlockSpec((D_pad, TN1), lambda i, j: (0, j))],  # W column tile (bf16)
            out_specs=(pl.BlockSpec((TM1, D_pad), lambda i, j: (i, 0)),  # normalized (resident)
                       pl.BlockSpec((TM1, TN1), lambda i, j: (i, j)))),  # XW tile
        compiler_params=pltpu.CompilerParams(
            dimension_semantics=("parallel", "arbitrary"),
            vmem_limit_bytes=vmem_limit),
        cost_estimate=pl.CostEstimate(
            flops=2 * N_pad * D_pad * D_pad + 8 * N_pad * D_pad,
            transcendentals=N_pad,
            bytes_accessed=N_pad * D_pad * 4 + D_pad * D_pad * op_bytes
                           + N_pad * D_pad * (4 + op_bytes)),
    )(x_pad, w_pad)

    # ---- stage 2: out = A @ XW + b - inputs -----------------------------------
    if xw_resident is None:
        xw_resident = N_pad * D_pad * op_bytes <= 4 * 1024 * 1024

    if xw_resident:
        # Whole XW stays in VMEM (constant block index -> fetched once); the
        # kernel slices the current K chunk with pl.ds.
        xw_spec = pl.BlockSpec((N_pad, D_pad), lambda i, k, cnt, kid: (0, 0))
    else:
        # Stream only the nonzero K tiles (data-dependent index map).
        xw_spec = pl.BlockSpec((TK, D_pad), lambda i, k, cnt, kid: (kid[i, k], 0))

    adj_spec = _block_spec((TM, TK), lambda i, k, cnt, kid: (i, kid[i, k]), buffers=3)

    nnz_steps = nI * max_k_steps
    out_pad = pl.pallas_call(
        functools.partial(_aggregate_kernel, tk=TK, xw_resident=xw_resident),
        out_shape=jax.ShapeDtypeStruct((N_pad, D_pad), f32),
        grid_spec=pltpu.PrefetchScalarGridSpec(
            num_scalar_prefetch=2,                                       # counts, kidx
            grid=(nI, max_k_steps),
            in_specs=[adj_spec,                                          # adjacency tile
                      xw_spec,                                           # XW (resident or streamed)
                      pl.BlockSpec((TM, D_pad), lambda i, k, cnt, kid: (i, 0)),  # residual
                      pl.BlockSpec((1, D_pad), lambda i, k, cnt, kid: (0, 0))],  # bias
            out_specs=pl.BlockSpec((TM, D_pad), lambda i, k, cnt, kid: (i, 0))), # acc/out
        compiler_params=pltpu.CompilerParams(
            dimension_semantics=("parallel", "arbitrary"),
            vmem_limit_bytes=vmem_limit),
        cost_estimate=pl.CostEstimate(
            flops=2 * nnz_steps * TM * TK * D_pad,
            transcendentals=0,
            bytes_accessed=nnz_steps * TM * TK * op_bytes
                           + N_pad * D_pad * (op_bytes + 4 + 4)),
    )(counts, kidx, adj, xw, inputs_norm, b_pad)

    return out_pad[:N, :D].astype(node_inputs.dtype)


# ---------------------------------------------------------------------------
# Pure-JAX f32 reference (module semantics, eval mode).
# ---------------------------------------------------------------------------
def _reference(node_inputs, edge_index, edge_weights, gcn_weight, gcn_bias):
    N = node_inputs.shape[0]
    mean = jnp.mean(node_inputs, axis=-1, keepdims=True)
    var = jnp.mean((node_inputs - mean) ** 2, axis=-1, keepdims=True)
    inputs = (node_inputs - mean) / jnp.sqrt(var + 1e-5)
    adj = jnp.zeros((N, N), jnp.float32).at[
        edge_index[:, 1], edge_index[:, 0]].add(edge_weights)
    return adj @ (inputs @ gcn_weight) + gcn_bias - inputs


if __name__ == "__main__":
    key = jax.random.PRNGKey(0)

    # ---- Test A: small graph (single tile) -----------------------------------
    N, D, E = 16, 32, 48
    k_x, k_w, k_b, k_src, k_dst, k_ew, key = jax.random.split(key, 7)
    node_inputs = jax.random.normal(k_x, (N, D), dtype=jnp.float32)
    lim = jnp.sqrt(6.0 / (D + D))
    gcn_weight = jax.random.uniform(k_w, (D, D), jnp.float32, -lim, lim)
    gcn_bias = 0.01 * jax.random.normal(k_b, (D,), jnp.float32)
    src = jax.random.randint(k_src, (E,), 0, N, dtype=jnp.int32)
    dst = jax.random.randint(k_dst, (E,), 0, N, dtype=jnp.int32)
    edge_index = jnp.stack([src, dst], axis=1)
    edge_weights = jax.random.uniform(k_ew, (E,), dtype=jnp.float32)

    ref = _reference(node_inputs, edge_index, edge_weights, gcn_weight, gcn_bias)

    out_f32 = node_encoder_forward(node_inputs, edge_index, edge_weights,
                                   gcn_weight, gcn_bias, matmul_dtype=jnp.float32)
    jax.block_until_ready(out_f32)
    assert jnp.allclose(out_f32, ref, atol=1e-4, rtol=1e-4), "A: f32 path mismatch"

    out_bf16 = node_encoder_forward(node_inputs, edge_index, edge_weights,
                                    gcn_weight, gcn_bias)
    jax.block_until_ready(out_bf16)
    assert jnp.allclose(out_bf16, ref, atol=5e-2, rtol=5e-2), "A: bf16 path mismatch"

    # ---- Test B: multi-tile graph with empty adjacency blocks ----------------
    # Rows >= 100 only have sources in [0, 100) -> their K tiles 1 and 2 are empty,
    # exercising the block-sparse skip, index padding, and per-row counts.
    N, D, E = 300, 32, 120
    k_x, k_w, k_b, k_src, k_dst, k_ew, key = jax.random.split(key, 7)
    node_inputs = jax.random.normal(k_x, (N, D), dtype=jnp.float32)
    gcn_weight = jax.random.uniform(k_w, (D, D), jnp.float32, -lim, lim)
    gcn_bias = 0.01 * jax.random.normal(k_b, (D,), jnp.float32)
    dst = jax.random.randint(k_dst, (E,), 0, N, dtype=jnp.int32)
    src_any = jax.random.randint(k_src, (E,), 0, N, dtype=jnp.int32)
    src = jnp.where(dst < 100, src_any, src_any % 100)
    edge_index = jnp.stack([src, dst], axis=1)
    edge_weights = jax.random.uniform(k_ew, (E,), dtype=jnp.float32)

    ref = _reference(node_inputs, edge_index, edge_weights, gcn_weight, gcn_bias)

    out_f32 = node_encoder_forward(node_inputs, edge_index, edge_weights,
                                   gcn_weight, gcn_bias, matmul_dtype=jnp.float32,
                                   tile_m=128, tile_k=128)
    jax.block_until_ready(out_f32)
    assert jnp.allclose(out_f32, ref, atol=1e-4, rtol=1e-4), "B: f32 sparse path mismatch"

    out_stream = node_encoder_forward(node_inputs, edge_index, edge_weights,
                                      gcn_weight, gcn_bias,
                                      tile_m=128, tile_k=128, xw_resident=False)
    jax.block_until_ready(out_stream)
    assert jnp.allclose(out_stream, ref, atol=5e-2, rtol=5e-2), "B: streamed bf16 mismatch"

    print("KERNEL_OK")
</pallas_src>

<mosaic_0001>
module attributes {stable_mosaic.version = 11 : i64} {
  func.func @_ln_xw_kernel(%arg0: i32, %arg1: i32, %arg2: memref<128x128xf32, #tpu.memory_space<vmem>>, %arg3: memref<128x128xf32, #tpu.memory_space<vmem>>, %arg4: memref<128x128xf32, #tpu.memory_space<vmem>>, %arg5: memref<128x128xf32, #tpu.memory_space<vmem>>) attributes {dimension_semantics = [#tpu.dimension_semantics<parallel>, #tpu.dimension_semantics<arbitrary>], iteration_bounds = array<i64: 1, 1>, scalar_prefetch = 0 : i64, scratch_operands = 0 : i64, tpu.core_type = #tpu.core_type<tc>, window_params = [{transform_indices = @transform_0, window_bounds = array<i64: 128, 128>}, {transform_indices = @transform_1, window_bounds = array<i64: 128, 128>}, {transform_indices = @transform_2, window_bounds = array<i64: 128, 128>}, {transform_indices = @transform_3, window_bounds = array<i64: 128, 128>}]} {
    %c0 = arith.constant 0 : index
    %c0_0 = arith.constant 0 : index
    %0 = vector.load %arg2[%c0, %c0_0] : memref<128x128xf32, #tpu.memory_space<vmem>>, vector<128x128xf32>
    %cst = arith.constant dense<0.000000e+00> : vector<128xf32>
    %1 = vector.multi_reduction <add>, %0, %cst [1] : vector<128x128xf32> to vector<128xf32>
    %2 = vector.shape_cast %1 : vector<128xf32> to vector<128x1xf32>
    %cst_1 = arith.constant 3.125000e-02 : f32
    %3 = vector.broadcast %cst_1 : f32 to vector<128x1xf32>
    %4 = arith.mulf %2, %3 : vector<128x1xf32>
    %5 = vector.broadcast %4 : vector<128x1xf32> to vector<128x128xf32>
    %6 = arith.subf %0, %5 : vector<128x128xf32>
    %7 = tpu.iota {dimensions = array<i32: 1>} : vector<128x128xi32>
    %c32_i32 = arith.constant 32 : i32
    %8 = vector.broadcast %c32_i32 : i32 to vector<128x128xi32>
    %9 = arith.cmpi slt, %7, %8 : vector<128x128xi32>
    %cst_2 = arith.constant 0.000000e+00 : f32
    %10 = vector.broadcast %cst_2 : f32 to vector<128x128xf32>
    %11 = arith.select %9, %6, %10 : vector<128x128xi1>, vector<128x128xf32>
    %12 = arith.mulf %11, %11 : vector<128x128xf32>
    %cst_3 = arith.constant dense<0.000000e+00> : vector<128xf32>
    %13 = vector.multi_reduction <add>, %12, %cst_3 [1] : vector<128x128xf32> to vector<128xf32>
    %14 = vector.shape_cast %13 : vector<128xf32> to vector<128x1xf32>
    %cst_4 = arith.constant 3.125000e-02 : f32
    %15 = vector.broadcast %cst_4 : f32 to vector<128x1xf32>
    %16 = arith.mulf %14, %15 : vector<128x1xf32>
    %cst_5 = arith.constant 9.99999974E-6 : f32
    %17 = vector.broadcast %cst_5 : f32 to vector<128x1xf32>
    %18 = arith.addf %16, %17 : vector<128x1xf32>
    %19 = math.rsqrt %18 : vector<128x1xf32>
    %20 = vector.broadcast %19 : vector<128x1xf32> to vector<128x128xf32>
    %21 = arith.mulf %11, %20 : vector<128x128xf32>
    %c0_i32 = arith.constant 0 : i32
    %22 = arith.cmpi eq, %arg1, %c0_i32 : i32
    %23 = arith.extui %22 : i1 to i32
    %c0_i32_6 = arith.constant 0 : i32
    %24 = arith.cmpi ne, %23, %c0_i32_6 : i32
    scf.if %24 {
      %c0_12 = arith.constant 0 : index
      %c0_13 = arith.constant 0 : index
      %28 = vector.load %arg4[%c0_12, %c0_13] : memref<128x128xf32, #tpu.memory_space<vmem>>, vector<128x128xf32>
      tpu.vector_store %arg4[%c0_12, %c0_13], %21 {strides = array<i32>} : memref<128x128xf32, #tpu.memory_space<vmem>>, vector<128x128xf32>,
    } else {
    }
    %c0_7 = arith.constant 0 : index
    %c0_8 = arith.constant 0 : index
    %25 = vector.load %arg3[%c0_7, %c0_8] : memref<128x128xf32, #tpu.memory_space<vmem>>, vector<128x128xf32>
    %cst_9 = arith.constant dense<0.000000e+00> : vector<128x128xf32>
    %26 = tpu.matmul %21, %25, %cst_9 {dimension_numbers = #tpu.dot_dimension_numbers<[1], [0], [0], [1], [0, 0, 1, 1], [], []>} : vector<128x128xf32>, vector<128x128xf32>, vector<128x128xf32> -> vector<128x128xf32>
    %c0_10 = arith.constant 0 : index
    %c0_11 = arith.constant 0 : index
    %27 = vector.load %arg5[%c0_10, %c0_11] : memref<128x128xf32, #tpu.memory_space<vmem>>, vector<128x128xf32>
    tpu.vector_store %arg5[%c0_10, %c0_11], %26 {strides = array<i32>} : memref<128x128xf32, #tpu.memory_space<vmem>>, vector<128x128xf32>,
    return
  }
  func.func @transform_0(%arg0: i32, %arg1: i32) -> (i32, i32) {
    %c0_i32 = arith.constant 0 : i32
    %c0_i32_0 = arith.constant 0 : i32
    return %arg0, %c0_i32 : i32, i32
  }
  func.func @transform_1(%arg0: i32, %arg1: i32) -> (i32, i32) {
    %c0_i32 = arith.constant 0 : i32
    %c0_i32_0 = arith.constant 0 : i32
    return %c0_i32, %arg1 : i32, i32
  }
  func.func @transform_2(%arg0: i32, %arg1: i32) -> (i32, i32) {
    %c0_i32 = arith.constant 0 : i32
    %c0_i32_0 = arith.constant 0 : i32
    return %arg0, %c0_i32 : i32, i32
  }
  func.func @transform_3(%arg0: i32, %arg1: i32) -> (i32, i32) {
    %c0_i32 = arith.constant 0 : i32
    return %arg0, %arg1 : i32, i32
  }
}

</mosaic_0001>

<bundles_post_ra>
// kernel: tpu_custom_call.1
= control target key start
LH: loop header
LB: loop body
LE: loop exit
PB: predicated region body
PF: predicated region fallthrough
CT: control target
= control target key end

     0   :  { %9 = vsyncpa [#allocation3], 0  ;;  %s960_s0 = inlined_call_operand.hbm [shape: f32[128,128], index: 0, kind: input, shape index: {}]   ;;  %s961_s1 = inlined_call_operand.hbm [shape: f32[128,128], index: 1, kind: input, shape index: {}]   ;;  %s962_s2 = inlined_call_operand.hbm [shape: f32[128,128], index: 2, kind: output, shape index: {0}]   ;;  %s963_s3 = inlined_call_operand.hbm [shape: f32[128,128], index: 3, kind: output, shape index: {1}]  }
   0x1   :  { %10 = vsyncpa [#allocation6], 0 }
   0x2   :  { %11 = vsyncpa [#allocation4], 0 }
   0x3   :  { %12 = vsyncpa [#allocation9], 0  ;;  %s731_s12 = smov [#allocation2]  }
   0x4   :  { %s18_s13 = sshll.u32 %s731_s12, 4  ;;  %s19_s13 = int_to_ptr.vmem [resolvable:$true] %s18_s13 }
   0x5   :  { %s651_s14 = scalar_lea.vmem %s19_s13, 2048  ;;  %p656_p1 = scmp.lt.s32.totalorder %s19_s13, %s19_s13 }
   0x6   :  { %p652_p0 = scmp.ne.s32.totalorder %s19_s13, %s651_s14  ;;  %p657_p2 = scmp.lt.s32.totalorder %s651_s14, %s651_s14 }
   0x8   :  { %p658_p3 = por %p657_p2, %p656_p1 }
   0xa   :  { %p659_p4 = pnand %p658_p3, %p652_p0 }
   0xc   :  { %662 = shalt.err (!%p659_p4)
}
   0xd   :  { %s732_s15 = smov 128   ;;  %s733_s16 = smov 8  }
   0xe   :  { %24 = dma.hbm_to_vmem [thread:$0]  %s960_s0, 2048, %s19_s13, [#allocation3], %s732_s15, %s732_s15, %s733_s16  }
   0xf   :  { %s734_s19 = smov [#allocation5]  }
  0x10   :  { %s30_s20 = sshll.u32 %s734_s19, 4  ;;  %s31_s20 = int_to_ptr.vmem [resolvable:$true] %s30_s20 }
  0x11   :  { %s671_s21 = scalar_lea.vmem %s31_s20, 2048  ;;  %p676_p6 = scmp.lt.s32.totalorder %s31_s20, %s31_s20 }
  0x12   :  { %p672_p5 = scmp.ne.s32.totalorder %s31_s20, %s671_s21  ;;  %p677_p7 = scmp.lt.s32.totalorder %s671_s21, %s671_s21 }
  0x14   :  { %p678_p8 = por %p677_p7, %p676_p6 }
  0x16   :  { %p679_p9 = pnand %p678_p8, %p672_p5 }
  0x18   :  { %682 = shalt.err (!%p679_p9)
}
  0x19   :  { %36 = dma.hbm_to_vmem [thread:$0]  %s961_s1, 2048, %s31_s20, [#allocation6], %s732_s15, %s732_s15, %s733_s16  }
  0x1a   :  { %723 = dma.done.wait [#allocation3], 2048  }
  0x1b   :  { %724 = vsyncadd [#allocation3], 4294965248 }
  0x1c   :  { %725 = dma.done.wait [#allocation6], 2048  }
  0x1d   :  { %726 = vsyncadd [#allocation6], 4294965248  ;;  %v769_v0 = vld [vmem:[#allocation2] sm:$0xff]  ;;  %v771_v1 = vld [vmem:[#allocation2 + $0x8] sm:$0xff]  ;;  %v123_v20 = vlaneseq  ;;  %s735_s0 = smov [#allocation7]  }
  0x1e   :  { %59 = vadd.xlane.f32.xlu0 %v769_v0  ;;  %61 = vadd.xlane.f32.xlu1 %v771_v1  ;;  %v775_v2 = vld [vmem:[#allocation2 + $0x40] sm:$0xff]  ;;  %v777_v3 = vld [vmem:[#allocation2 + $0x48] sm:$0xff]  ;;  %v781_v4 = vld [vmem:[#allocation2 + $0x10] sm:$0xff]  ;;  %s456_s1 = sshll.u32 %s735_s0, 4  ;;  %s457_s1 = int_to_ptr.vmem [resolvable:$true] %s456_s1 }
  0x1f   :  { %v783_v5 = vld [vmem:[#allocation2 + $0x50] sm:$0xff]  ;;  %v787_v6 = vld [vmem:[#allocation2 + $0x18] sm:$0xff]  ;;  %v793_v8 = vld [vmem:[#allocation2 + $0x20] sm:$0xff]  ;;  %v817_v21 = vand.u32 127, %v123_v20  ;;  %s683_s24 = scalar_lea.vmem %s457_s1, 2048  ;;  %p688_p11 = scmp.lt.s32.totalorder %s457_s1, %s457_s1 }
  0x20   :  { %v789_v7 = vld [vmem:[#allocation2 + $0x58] sm:$0xff]  ;;  %v795_v9 = vld [vmem:[#allocation2 + $0x60] sm:$0xff]  ;;  %v799_v10 = vld [vmem:[#allocation2 + $0x28] sm:$0xff]  ;;  %p684_p10 = scmp.ne.s32.totalorder %s457_s1, %s683_s24  ;;  %p689_p12 = scmp.lt.s32.totalorder %s683_s24, %s683_s24 }
  0x21   :  { %v801_v11 = vld [vmem:[#allocation2 + $0x68] sm:$0xff]  ;;  %v805_v12 = vld [vmem:[#allocation2 + $0x30] sm:$0xff]  ;;  %v811_v14 = vld [vmem:[#allocation2 + $0x38] sm:$0xff]  ;;  %vm125_vm0 = vcmp.lt.s32.totalorder %v817_v21, 32 }
  0x22   :  { %75 = vadd.xlane.f32.xlu0 %v775_v2  ;;  %77 = vadd.xlane.f32.xlu1 %v777_v3  ;;  %v807_v13 = vld [vmem:[#allocation2 + $0x70] sm:$0xff]  ;;  %v813_v15 = vld [vmem:[#allocation2 + $0x78] sm:$0xff]  ;;  %v287_v18 = vld [vmem:[#allocation5 + $0x68] sm:$0xff]  ;;  %p690_p13 = por %p689_p12, %p688_p11 }
  0x23   :  { %v289_v16 = vld [vmem:[#allocation5 + $0x78] sm:$0xff]  ;;  %v288_v17 = vld [vmem:[#allocation5 + $0x70] sm:$0xff]  ;;  %v286_v19 = vld [vmem:[#allocation5 + $0x60] sm:$0xff] }
  0x24   :  { %517 = vmatprep.subr.mxu0 %v289_v16  ;;  %573 = vmatprep.subr.mxu1 %v289_v16  ;;  %v276_v21 = vld [vmem:[#allocation5 + $0x10] sm:$0xff]  ;;  %p691_p0 = pnand %p690_p13, %p684_p10 }
  0x25   :  { %518 = vmatpush3.msra.mxu0 %v289_v16  ;;  %589 = vmatpush3.msra.mxu1 %v289_v16 }
  0x26   :  { %63 = vadd.xlane.f32.xlu0 %v781_v4  ;;  %79 = vadd.xlane.f32.xlu1 %v783_v5 }
  0x27   :  { %519 = vmatprep.subr.mxu0 %v288_v17  ;;  %574 = vmatprep.subr.mxu1 %v288_v17 }
  0x28   :  { %520 = vmatpush3.msra.mxu0 %v288_v17  ;;  %590 = vmatpush3.msra.mxu1 %v288_v17 }
  0x29   :  { %521 = vmatprep.subr.mxu0 %v287_v18  ;;  %575 = vmatprep.subr.mxu1 %v287_v18 }
  0x2a   :  { %65 = vadd.xlane.f32.xlu0 %v787_v6  ;;  %81 = vadd.xlane.f32.xlu1 %v789_v7 }
  0x2b   :  { %522 = vmatpush3.msra.mxu0 %v287_v18  ;;  %591 = vmatpush3.msra.mxu1 %v287_v18 }
  0x2c   :  { %523 = vmatprep.subr.mxu0 %v286_v19  ;;  %576 = vmatprep.subr.mxu1 %v286_v19 }
  0x2d   :  { %524 = vmatpush3.msra.mxu0 %v286_v19  ;;  %592 = vmatpush3.msra.mxu1 %v286_v19  ;;  %v283_v19 = vld [vmem:[#allocation5 + $0x48] sm:$0xff] }
  0x2e   :  { %67 = vadd.xlane.f32.xlu0 %v793_v8  ;;  %83 = vadd.xlane.f32.xlu1 %v795_v9 }
  0x32   :  { %69 = vadd.xlane.f32.xlu0 %v799_v10  ;;  %85 = vadd.xlane.f32.xlu1 %v801_v11 }
  0x36   :  { %71 = vadd.xlane.f32.xlu0 %v805_v12  ;;  %87 = vadd.xlane.f32.xlu1 %v807_v13 }
  0x3a   :  { %73 = vadd.xlane.f32.xlu0 %v811_v14  ;;  %89 = vadd.xlane.f32.xlu1 %v813_v15 }
  0xa7   :  { %v60_v22 = vpop.xlane.xlu0 %59  ;;  %v62_v23 = vpop.xlane.xlu1 %61 }
  0xa8   :  { %v91_v24 = vmul.f32 0.03125, %v60_v22  ;;  %v92_v25 = vmul.f32 0.03125, %v62_v23 }
  0xaa   :  { %v107_v26 = vsub.f32 %v769_v0, %v91_v24  ;;  %v108_v27 = vsub.f32 %v771_v1, %v92_v25  ;;  %v285_v0 = vld [vmem:[#allocation5 + $0x58] sm:$0xff] }
  0xab   :  { %v76_v28 = vpop.xlane.xlu0 %75  ;;  %v78_v29 = vpop.xlane.xlu1 %77  ;;  %525 = vmatprep.subr.mxu0 %v285_v0  ;;  %577 = vmatprep.subr.mxu1 %v285_v0 }
  0xac   :  { %v99_v30 = vmul.f32 0.03125, %v76_v28  ;;  %v100_v31 = vmul.f32 0.03125, %v78_v29  ;;  %v824_v32 = vsel %vm125_vm0, %v107_v26, 0.0  ;;  %v828_v33 = vsel %vm125_vm0, %v108_v27, 0.0  ;;  %526 = vmatpush3.msra.mxu0 %v285_v0  ;;  %593 = vmatpush3.msra.mxu1 %v285_v0  ;;  %v282_v26 = vld [vmem:[#allocation5 + $0x40] sm:$0xff] }
  0xad   :  { %v142_v34 = vmul.f32 %v824_v32, %v824_v32  ;;  %v143_v39 = vmul.f32 %v828_v33, %v828_v33 }
  0xae   :  { %v115_v35 = vsub.f32 %v775_v2, %v99_v30  ;;  %v116_v36 = vsub.f32 %v777_v3, %v100_v31  ;;  %v281_v30 = vld [vmem:[#allocation5 + $0x38] sm:$0xff] }
  0xaf   :  { %158 = vadd.xlane.f32.xlu0 %v142_v34  ;;  %v64_v37 = vpop.xlane.xlu0 %63  ;;  %v80_v38 = vpop.xlane.xlu1 %79 }
  0xb0   :  { %v93_v40 = vmul.f32 0.03125, %v64_v37  ;;  %v101_v41 = vmul.f32 0.03125, %v80_v38  ;;  %v838_v42 = vsel %vm125_vm0, %v115_v35, 0.0  ;;  %v842_v43 = vsel %vm125_vm0, %v116_v36, 0.0  ;;  %v280_v38 = vld [vmem:[#allocation5 + $0x30] sm:$0xff] }
  0xb1   :  { %v150_v44 = vmul.f32 %v838_v42, %v838_v42  ;;  %v151_v49 = vmul.f32 %v842_v43, %v842_v43 }
  0xb2   :  { %v109_v45 = vsub.f32 %v781_v4, %v93_v40  ;;  %v117_v46 = vsub.f32 %v783_v5, %v101_v41  ;;  %v284_v4 = vld [vmem:[#allocation5 + $0x50] sm:$0xff] }
  0xb3   :  { %160 = vadd.xlane.f32.xlu0 %v143_v39  ;;  %174 = vadd.xlane.f32.xlu1 %v150_v44  ;;  %v66_v47 = vpop.xlane.xlu0 %65  ;;  %v82_v48 = vpop.xlane.xlu1 %81 }
  0xb4   :  { %v94_v50 = vmul.f32 0.03125, %v66_v47  ;;  %v102_v51 = vmul.f32 0.03125, %v82_v48  ;;  %v852_v52 = vsel %vm125_vm0, %v109_v45, 0.0  ;;  %v856_v53 = vsel %vm125_vm0, %v117_v46, 0.0  ;;  %527 = vmatprep.subr.mxu0 %v284_v4  ;;  %578 = vmatprep.subr.mxu1 %v284_v4  ;;  %v279_v46 = vld [vmem:[#allocation5 + $0x28] sm:$0xff] }
  0xb5   :  { %v144_v54 = vmul.f32 %v852_v52, %v852_v52  ;;  %v152_v59 = vmul.f32 %v856_v53, %v856_v53  ;;  %528 = vmatpush3.msra.mxu0 %v284_v4  ;;  %594 = vmatpush3.msra.mxu1 %v284_v4 }
  0xb6   :  { %v110_v55 = vsub.f32 %v787_v6, %v94_v50  ;;  %v118_v56 = vsub.f32 %v789_v7, %v102_v51  ;;  %529 = vmatprep.subr.mxu0 %v283_v19  ;;  %579 = vmatprep.subr.mxu1 %v283_v19  ;;  %v277_v51 = vld [vmem:[#allocation5 + $0x18] sm:$0xff] }
  0xb7   :  { %176 = vadd.xlane.f32.xlu1 %v151_v49  ;;  %162 = vadd.xlane.f32.xlu0 %v144_v54  ;;  %v68_v57 = vpop.xlane.xlu0 %67  ;;  %v84_v58 = vpop.xlane.xlu1 %83  ;;  %v275_v54 = vld [vmem:[#allocation5 + $0x8] sm:$0xff] }
  0xb8   :  { %v95_v60 = vmul.f32 0.03125, %v68_v57  ;;  %v103_v61 = vmul.f32 0.03125, %v84_v58  ;;  %v866_v62 = vsel %vm125_vm0, %v110_v55, 0.0  ;;  %v870_v63 = vsel %vm125_vm0, %v118_v56, 0.0  ;;  %530 = vmatpush3.msra.mxu0 %v283_v19  ;;  %595 = vmatpush3.msra.mxu1 %v283_v19  ;;  %v274_v55 = vld [vmem:[#allocation5] sm:$0xff] }
  0xb9   :  { %v145_v1 = vmul.f32 %v866_v62, %v866_v62  ;;  %v153_v7 = vmul.f32 %v870_v63, %v870_v63  ;;  %531 = vmatprep.subr.mxu0 %v282_v26  ;;  %580 = vmatprep.subr.mxu1 %v282_v26 }
  0xba   :  { %v111_v2 = vsub.f32 %v793_v8, %v95_v60  ;;  %v119_v3 = vsub.f32 %v795_v9, %v103_v61  ;;  %532 = vmatpush3.msra.mxu0 %v282_v26  ;;  %596 = vmatpush3.msra.mxu1 %v282_v26 }
  0xbb   :  { %178 = vadd.xlane.f32.xlu1 %v152_v59  ;;  %164 = vadd.xlane.f32.xlu0 %v145_v1  ;;  %v70_v5 = vpop.xlane.xlu0 %69  ;;  %v86_v6 = vpop.xlane.xlu1 %85 }
  0xbc   :  { %v96_v16 = vmul.f32 0.03125, %v70_v5  ;;  %v104_v17 = vmul.f32 0.03125, %v86_v6  ;;  %v880_v18 = vsel %vm125_vm0, %v111_v2, 0.0  ;;  %v884_v8 = vsel %vm125_vm0, %v119_v3, 0.0  ;;  %533 = vmatprep.subr.mxu0 %v281_v30  ;;  %581 = vmatprep.subr.mxu1 %v281_v30 }
  0xbd   :  { %v146_v9 = vmul.f32 %v880_v18, %v880_v18  ;;  %v154_v25 = vmul.f32 %v884_v8, %v884_v8  ;;  %534 = vmatpush3.msra.mxu0 %v281_v30  ;;  %597 = vmatpush3.msra.mxu1 %v281_v30 }
  0xbe   :  { %v112_v20 = vsub.f32 %v799_v10, %v96_v16  ;;  %v120_v22 = vsub.f32 %v801_v11, %v104_v17  ;;  %535 = vmatprep.subr.mxu0 %v280_v38  ;;  %582 = vmatprep.subr.mxu1 %v280_v38 }
  0xbf   :  { %180 = vadd.xlane.f32.xlu1 %v153_v7  ;;  %166 = vadd.xlane.f32.xlu0 %v146_v9  ;;  %v72_v23 = vpop.xlane.xlu0 %71  ;;  %v88_v24 = vpop.xlane.xlu1 %87 }
  0xc0   :  { %v97_v27 = vmul.f32 0.03125, %v72_v23  ;;  %v105_v28 = vmul.f32 0.03125, %v88_v24  ;;  %v894_v29 = vsel %vm125_vm0, %v112_v20, 0.0  ;;  %v898_v10 = vsel %vm125_vm0, %v120_v22, 0.0  ;;  %536 = vmatpush3.msra.mxu0 %v280_v38  ;;  %598 = vmatpush3.msra.mxu1 %v280_v38 }
  0xc1   :  { %v147_v11 = vmul.f32 %v894_v29, %v894_v29  ;;  %v155_v37 = vmul.f32 %v898_v10, %v898_v10  ;;  %537 = vmatprep.subr.mxu0 %v279_v46  ;;  %583 = vmatprep.subr.mxu1 %v279_v46 }
  0xc2   :  { %v113_v31 = vsub.f32 %v805_v12, %v97_v27  ;;  %v121_v34 = vsub.f32 %v807_v13, %v105_v28  ;;  %538 = vmatpush3.msra.mxu0 %v279_v46  ;;  %599 = vmatpush3.msra.mxu1 %v279_v46 }
  0xc3   :  { %182 = vadd.xlane.f32.xlu1 %v154_v25  ;;  %168 = vadd.xlane.f32.xlu0 %v147_v11  ;;  %v74_v35 = vpop.xlane.xlu0 %73  ;;  %v90_v36 = vpop.xlane.xlu1 %89 }
  0xc4   :  { %v98_v39 = vmul.f32 0.03125, %v74_v35  ;;  %v106_v40 = vmul.f32 0.03125, %v90_v36  ;;  %v908_v41 = vsel %vm125_vm0, %v113_v31, 0.0  ;;  %v912_v12 = vsel %vm125_vm0, %v121_v34, 0.0 }
  0xc5   :  { %v148_v13 = vmul.f32 %v908_v41, %v908_v41  ;;  %v156_v47 = vmul.f32 %v912_v12, %v912_v12 }
  0xc6   :  { %v114_v44 = vsub.f32 %v811_v14, %v98_v39  ;;  %v122_v45 = vsub.f32 %v813_v15, %v106_v40  ;;  %v278_v15 = vld [vmem:[#allocation5 + $0x20] sm:$0xff] }
  0xc7   :  { %184 = vadd.xlane.f32.xlu1 %v155_v37  ;;  %170 = vadd.xlane.f32.xlu0 %v148_v13 }
  0xc8   :  { %v922_v48 = vsel %vm125_vm0, %v114_v44, 0.0  ;;  %v926_v49 = vsel %vm125_vm0, %v122_v45, 0.0  ;;  %539 = vmatprep.subr.mxu0 %v278_v15  ;;  %584 = vmatprep.subr.mxu1 %v278_v15 }
  0xc9   :  { %v149_v14 = vmul.f32 %v922_v48, %v922_v48  ;;  %v157_v50 = vmul.f32 %v926_v49, %v926_v49  ;;  %540 = vmatpush3.msra.mxu0 %v278_v15  ;;  %600 = vmatpush3.msra.mxu1 %v278_v15 }
  0xca   :  { %541 = vmatprep.subr.mxu0 %v277_v51  ;;  %585 = vmatprep.subr.mxu1 %v277_v51 }
  0xcb   :  { %186 = vadd.xlane.f32.xlu1 %v156_v47  ;;  %172 = vadd.xlane.f32.xlu0 %v149_v14 }
  0xcc   :  { %542 = vmatpush3.msra.mxu0 %v277_v51  ;;  %601 = vmatpush3.msra.mxu1 %v277_v51 }
  0xcd   :  { %543 = vmatprep.subr.mxu0 %v276_v21  ;;  %586 = vmatprep.subr.mxu1 %v276_v21 }
  0xce   :  { %544 = vmatpush3.msra.mxu0 %v276_v21  ;;  %602 = vmatpush3.msra.mxu1 %v276_v21 }
  0xcf   :  { %188 = vadd.xlane.f32.xlu1 %v157_v50  ;;  %545 = vmatprep.subr.mxu0 %v275_v54 }
  0xd0   :  { %546 = vmatpush3.msra.mxu0 %v275_v54  ;;  %587 = vmatprep.subr.mxu1 %v275_v54 }
  0xd1   :  { %547 = vmatprep.subr.mxu0 %v274_v55  ;;  %603 = vmatpush3.msra.mxu1 %v275_v54 }
  0xd2   :  { %548 = vmatpush3.msra.mxu0 %v274_v55  ;;  %588 = vmatprep.subr.mxu1 %v274_v55 }
  0xd3   :  { %604 = vmatpush3.msra.mxu1 %v274_v55 }
 0x138   :  { %v159_v56 = vpop.xlane.xlu0 %158 }
 0x139   :  { %v190_v57 = vmul.f32 0.03125, %v159_v56 }
 0x13b   :  { %v206_v58 = vadd.f32 1e-05, %v190_v57 }
 0x13c   :  { %v175_v59 = vpop.xlane.xlu1 %174  ;;  %v161_v60 = vpop.xlane.xlu0 %160 }
 0x13d   :  { %611 = vrsqrt.f32 %v206_v58  ;;  %v198_v61 = vmul.f32 0.03125, %v175_v59  ;;  %v191_v0 = vmul.f32 0.03125, %v161_v60 }
 0x13f   :  { %v214_v1 = vadd.f32 1e-05, %v198_v61  ;;  %v207_v2 = vadd.f32 1e-05, %v191_v0 }
 0x140   :  { %v177_v3 = vpop.xlane.xlu1 %176  ;;  %v163_v4 = vpop.xlane.xlu0 %162 }
 0x141   :  { %613 = vrsqrt.f32 %v214_v1  ;;  %v199_v5 = vmul.f32 0.03125, %v177_v3  ;;  %v192_v6 = vmul.f32 0.03125, %v163_v4 }
 0x142   :  { %615 = vrsqrt.f32 %v207_v2 }
 0x143   :  { %v215_v7 = vadd.f32 1e-05, %v199_v5  ;;  %v208_v16 = vadd.f32 1e-05, %v192_v6 }
 0x144   :  { %v179_v17 = vpop.xlane.xlu1 %178  ;;  %v165_v9 = vpop.xlane.xlu0 %164 }
 0x145   :  { %617 = vrsqrt.f32 %v215_v7  ;;  %v200_v19 = vmul.f32 0.03125, %v179_v17  ;;  %v193_v20 = vmul.f32 0.03125, %v165_v9 }
 0x146   :  { %619 = vrsqrt.f32 %v208_v16 }
 0x147   :  { %v216_v22 = vadd.f32 1e-05, %v200_v19  ;;  %v209_v23 = vadd.f32 1e-05, %v193_v20 }
 0x148   :  { %v181_v24 = vpop.xlane.xlu1 %180  ;;  %v167_v25 = vpop.xlane.xlu0 %166 }
 0x149   :  { %621 = vrsqrt.f32 %v216_v22  ;;  %v201_v26 = vmul.f32 0.03125, %v181_v24  ;;  %v194_v27 = vmul.f32 0.03125, %v167_v25 }
 0x14a   :  { %v612_v28 = vpop.eup %611  ;;  %623 = vrsqrt.f32 %v209_v23 }
 0x14b   :  { %v217_v11 = vadd.f32 1e-05, %v201_v26  ;;  %v210_v30 = vadd.f32 1e-05, %v194_v27  ;;  %v238_v31 = vmul.f32 %v612_v28, %v824_v32 }
 0x14c   :  { %v183_v34 = vpop.xlane.xlu1 %182  ;;  %v169_v35 = vpop.xlane.xlu0 %168 }
 0x14d   :  { %625 = vrsqrt.f32 %v217_v11  ;;  %v202_v36 = vmul.f32 0.03125, %v183_v34  ;;  %v195_v37 = vmul.f32 0.03125, %v169_v35  ;;  %258 = vst [vmem:[#allocation7] sm:$0xff] %v238_v31  ;;  %549 = vmatprep.mubr.f32.mxu0 %v238_v31 }
 0x14e   :  { %v614_v38 = vpop.eup %613  ;;  %627 = vrsqrt.f32 %v210_v30 }
 0x14f   :  { %v616_v39 = vpop.eup %615  ;;  %v218_v40 = vadd.f32 1e-05, %v202_v36  ;;  %v211_v13 = vadd.f32 1e-05, %v195_v37  ;;  %v246_v44 = vmul.f32 %v614_v38, %v838_v42 }
 0x150   :  { %v185_v45 = vpop.xlane.xlu1 %184  ;;  %v171_v46 = vpop.xlane.xlu0 %170  ;;  %v239_v47 = vmul.f32 %v616_v39, %v828_v33 }
 0x151   :  { %629 = vrsqrt.f32 %v218_v40  ;;  %v203_v32 = vmul.f32 0.03125, %v185_v45  ;;  %v196_v14 = vmul.f32 0.03125, %v171_v46  ;;  %266 = vst [vmem:[#allocation7 + $0x40] sm:$0xff] %v246_v44  ;;  %561 = vmatprep.mubr.f32.mxu1 %v246_v44 }
 0x152   :  { %v618_v15 = vpop.eup %617  ;;  %631 = vrsqrt.f32 %v211_v13  ;;  %259 = vst [vmem:[#allocation7 + $0x8] sm:$0xff] %v239_v47  ;;  %550 = vmatmul.mubr.f32.vlgmr.msra.gmra.mxu0 %v239_v47 }
 0x153   :  { %v620_v50 = vpop.eup %619  ;;  %v219_v51 = vadd.f32 1e-05, %v203_v32  ;;  %v212_v21 = vadd.f32 1e-05, %v196_v14  ;;  %v247_v54 = vmul.f32 %v618_v15, %v842_v43 }
 0x154   :  { %v187_v55 = vpop.xlane.xlu1 %186  ;;  %v173_v42 = vpop.xlane.xlu0 %172  ;;  %v240_v56 = vmul.f32 %v620_v50, %v852_v52 }
 0x155   :  { %633 = vrsqrt.f32 %v219_v51  ;;  %v204_v33 = vmul.f32 0.03125, %v187_v55  ;;  %v197_v57 = vmul.f32 0.03125, %v173_v42  ;;  %267 = vst [vmem:[#allocation7 + $0x48] sm:$0xff] %v247_v54  ;;  %562 = vmatmul.mubr.f32.vlgmr.msra.gmra.mxu1 %v247_v54 }
 0x156   :  { %v622_v58 = vpop.eup %621  ;;  %635 = vrsqrt.f32 %v212_v21  ;;  %260 = vst [vmem:[#allocation7 + $0x10] sm:$0xff] %v240_v56  ;;  %552 = vmatprep.mubr.f32.mxu0 %v240_v56 }
 0x157   :  { %v624_v59 = vpop.eup %623  ;;  %v220_v60 = vadd.f32 1e-05, %v204_v33  ;;  %v213_v61 = vadd.f32 1e-05, %v197_v57  ;;  %v248_v0 = vmul.f32 %v622_v58, %v856_v53 }
 0x158   :  { %v189_v1 = vpop.xlane.xlu1 %188  ;;  %v241_v43 = vmul.f32 %v624_v59, %v866_v62 }
 0x159   :  { %637 = vrsqrt.f32 %v220_v60  ;;  %v205_v2 = vmul.f32 0.03125, %v189_v1  ;;  %268 = vst [vmem:[#allocation7 + $0x50] sm:$0xff] %v248_v0  ;;  %564 = vmatprep.mubr.f32.mxu1 %v248_v0 }
 0x15a   :  { %v626_v52 = vpop.eup %625  ;;  %639 = vrsqrt.f32 %v213_v61  ;;  %261 = vst [vmem:[#allocation7 + $0x18] sm:$0xff] %v241_v43  ;;  %553 = vmatmul.mubr.f32.gmra.mxu0 %v241_v43 }
 0x15b   :  { %v628_v3 = vpop.eup %627  ;;  %v221_v4 = vadd.f32 1e-05, %v205_v2  ;;  %v249_v5 = vmul.f32 %v626_v52, %v870_v63 }
 0x15c   :  { %v242_v6 = vmul.f32 %v628_v3, %v880_v18 }
 0x15d   :  { %641 = vrsqrt.f32 %v221_v4  ;;  %269 = vst [vmem:[#allocation7 + $0x58] sm:$0xff] %v249_v5  ;;  %565 = vmatmul.mubr.f32.gmra.mxu1 %v249_v5 }
 0x15e   :  { %v630_v53 = vpop.eup %629  ;;  %262 = vst [vmem:[#allocation7 + $0x20] sm:$0xff] %v242_v6  ;;  %555 = vmatprep.mubr.f32.mxu0 %v242_v6 }
 0x15f   :  { %v632_v62 = vpop.eup %631  ;;  %v250_v7 = vmul.f32 %v630_v53, %v884_v8 }
 0x160   :  { %v243_v16 = vmul.f32 %v632_v62, %v894_v29 }
 0x161   :  { %270 = vst [vmem:[#allocation7 + $0x60] sm:$0xff] %v250_v7  ;;  %567 = vmatprep.mubr.f32.mxu1 %v250_v7 }
 0x162   :  { %v634_v17 = vpop.eup %633  ;;  %263 = vst [vmem:[#allocation7 + $0x28] sm:$0xff] %v243_v16  ;;  %556 = vmatmul.mubr.f32.gmra.mxu0 %v243_v16 }
 0x163   :  { %v636_v9 = vpop.eup %635  ;;  %v251_v63 = vmul.f32 %v634_v17, %v898_v10 }
 0x164   :  { %v244_v18 = vmul.f32 %v636_v9, %v908_v41 }
 0x165   :  { %271 = vst [vmem:[#allocation7 + $0x68] sm:$0xff] %v251_v63  ;;  %568 = vmatmul.mubr.f32.gmra.mxu1 %v251_v63 }
 0x166   :  { %v638_v19 = vpop.eup %637  ;;  %264 = vst [vmem:[#allocation7 + $0x30] sm:$0xff] %v244_v18  ;;  %558 = vmatprep.mubr.f32.mxu0 %v244_v18 }
 0x167   :  { %v640_v20 = vpop.eup %639  ;;  %v252_v8 = vmul.f32 %v638_v19, %v912_v12 }
 0x168   :  { %v245_v29 = vmul.f32 %v640_v20, %v922_v48 }
 0x169   :  { %272 = vst [vmem:[#allocation7 + $0x70] sm:$0xff] %v252_v8  ;;  %570 = vmatprep.mubr.f32.mxu1 %v252_v8 }
 0x16a   :  { %v642_v22 = vpop.eup %641  ;;  %265 = vst [vmem:[#allocation7 + $0x38] sm:$0xff] %v245_v29  ;;  %559 = vmatmul.mubr.f32.gmra.mxu0 %v245_v29 }
 0x16b   :  { %v253_v23 = vmul.f32 %v642_v22, %v926_v49 }
 0x16d   :  { %273 = vst [vmem:[#allocation7 + $0x78] sm:$0xff] %v253_v23  ;;  %571 = vmatmul.mubr.f32.gmra.mxu1 %v253_v23 }
 0x16e   :  { %694 = shalt.err (!%p691_p0)
}
 0x16f   :  { %462 = dma.vmem_to_hbm [thread:$0]  %s457_s1, 2048, %s962_s2, [#allocation4], %s732_s15, %s732_s15, %s733_s16  }
 0x170   :  { %s736_s2 = smov [#allocation8]  }
 0x171   :  { %s468_s27 = sshll.u32 %s736_s2, 4  ;;  %s469_s27 = int_to_ptr.vmem [resolvable:$true] %s468_s27 }
 0x172   :  { %s703_s28 = scalar_lea.vmem %s469_s27, 2048  ;;  %p708_p2 = scmp.lt.s32.totalorder %s469_s27, %s469_s27 }
 0x173   :  { %p704_p1 = scmp.ne.s32.totalorder %s469_s27, %s703_s28  ;;  %p709_p3 = scmp.lt.s32.totalorder %s703_s28, %s703_s28 }
 0x175   :  { %p710_p4 = por %p709_p3, %p708_p2 }
 0x177   :  { %p711_p5 = pnand %p710_p4, %p704_p1 }
 0x212   :  { %v551_v10 = vpop.f32.mrf.mxu0 }
 0x213   :  { %436 = vst [vmem:[#allocation8 + $0x8] sm:$0xff] %v551_v10 }
 0x214   :  { %v356_v41 = vpop.f32.mrf.mxu0 }
 0x215   :  { %435 = vst [vmem:[#allocation8] sm:$0xff] %v356_v41  ;;  %v563_v12 = vpop.f32.mrf.mxu1 }
 0x216   :  { %444 = vst [vmem:[#allocation8 + $0x48] sm:$0xff] %v563_v12 }
 0x217   :  { %v396_v48 = vpop.f32.mrf.mxu1 }
 0x218   :  { %443 = vst [vmem:[#allocation8 + $0x40] sm:$0xff] %v396_v48 }
 0x21a   :  { %v554_v49 = vpop.f32.mrf.mxu0 }
 0x21b   :  { %438 = vst [vmem:[#allocation8 + $0x18] sm:$0xff] %v554_v49 }
 0x21c   :  { %v366_v24 = vpop.f32.mrf.mxu0 }
 0x21d   :  { %437 = vst [vmem:[#allocation8 + $0x10] sm:$0xff] %v366_v24  ;;  %v566_v25 = vpop.f32.mrf.mxu1 }
 0x21e   :  { %446 = vst [vmem:[#allocation8 + $0x58] sm:$0xff] %v566_v25 }
 0x21f   :  { %v406_v26 = vpop.f32.mrf.mxu1 }
 0x220   :  { %445 = vst [vmem:[#allocation8 + $0x50] sm:$0xff] %v406_v26 }
 0x222   :  { %v557_v27 = vpop.f32.mrf.mxu0 }
 0x223   :  { %440 = vst [vmem:[#allocation8 + $0x28] sm:$0xff] %v557_v27 }
 0x224   :  { %v376_v28 = vpop.f32.mrf.mxu0 }
 0x225   :  { %439 = vst [vmem:[#allocation8 + $0x20] sm:$0xff] %v376_v28  ;;  %v569_v11 = vpop.f32.mrf.mxu1 }
 0x226   :  { %448 = vst [vmem:[#allocation8 + $0x68] sm:$0xff] %v569_v11 }
 0x227   :  { %v416_v30 = vpop.f32.mrf.mxu1 }
 0x228   :  { %447 = vst [vmem:[#allocation8 + $0x60] sm:$0xff] %v416_v30 }
 0x22a   :  { %v560_v31 = vpop.f32.mrf.mxu0 }
 0x22b   :  { %442 = vst [vmem:[#allocation8 + $0x38] sm:$0xff] %v560_v31 }
 0x22c   :  { %v386_v34 = vpop.f32.mrf.mxu0 }
 0x22d   :  { %441 = vst [vmem:[#allocation8 + $0x30] sm:$0xff] %v386_v34  ;;  %v572_v35 = vpop.f32.mrf.mxu1 }
 0x22e   :  { %450 = vst [vmem:[#allocation8 + $0x78] sm:$0xff] %v572_v35 }
 0x22f   :  { %v426_v36 = vpop.f32.mrf.mxu1 }
 0x230   :  { %449 = vst [vmem:[#allocation8 + $0x70] sm:$0xff] %v426_v36 }
 0x231   :  { %714 = shalt.err (!%p711_p5)
}
 0x232   :  { %474 = dma.vmem_to_hbm [thread:$0]  %s469_s27, 2048, %s963_s3, [#allocation9], %s732_s15, %s732_s15, %s733_s16  }
 0x233   :  { %727 = dma.done.wait [#allocation4], 2048  }
 0x234   :  { %728 = vsyncadd [#allocation4], 4294965248 }
 0x235   :  { %729 = dma.done.wait [#allocation9], 2048  }
 0x236   :  { %730 = vsyncadd [#allocation9], 4294965248 }
 0x237   :  { %481 = vsyncpa [#allocation3], 1 }
 0x238   :  { %482 = vsyncpa [#allocation6], 1 }
 0x239   :  { %483 = vsyncpa [#allocation4], 1 }
 0x23a   :  { %484 = vsyncpa [#allocation9], 1 }

</bundles_post_ra>
